<compile_context>
chip_gen: v6e
topology: v6e:2x2x1
jax: 0.10.0
libtpu: 0.0.40
codegen_flags: <defaults>
</compile_context>

<pallas_src>
import functools
import math

import jax
import jax.numpy as jnp
from jax.experimental import pallas as pl
from jax.experimental.pallas import tpu as pltpu


# ----------------------------------------------------------------------------------
# Helpers
# ----------------------------------------------------------------------------------
def _vmem_limit_bytes():
    """Per-generation scoped-VMEM limit with headroom (None -> compiler default)."""
    try:
        info = pltpu.get_tpu_info()
        cap = getattr(info, "vmem_capacity_bytes", None)
        if cap:
            return int(cap * 0.8)   # ~51 MiB on v7x (64 MiB), ~102 MiB on v5e/v6e (128 MiB)
    except Exception:
        pass
    return None


def _vmem_whole_spec():
    """Whole-array operand resident in VMEM: DMA'd once, outside the double-buffered
    pipeline (single copy) -- used for constant weights/biases."""
    return pl.BlockSpec(memory_space=pltpu.MemorySpace.VMEM)


def _choose_row_tile(L):
    """Row tile for the projection GEMMs (>=16 for bf16 sublane packing)."""
    if L <= 512:
        return L
    for t in (512, 256, 128, 64, 32, 16):
        if L % t == 0:
            return t
    return L


def _choose_q_tile(Lq, D, Lk, out_bytes, vmem_limit):
    """Largest q-row tile (>=16, prefer multiples of 256) dividing Lq that fits the
    per-step VMEM footprint of the attention kernel."""
    if Lq <= 256:
        return Lq
    budget = 0.6 * float(vmem_limit if vmem_limit else 48 * 1024 * 1024)
    divisors = [t for t in (1024, 512, 256, 128, 64, 32, 16) if t <= Lq and Lq % t == 0]
    if not divisors:
        return Lq                       # awkward Lq: single full-row block
    for t in divisors:                  # largest first
        est = (2 * t * D * 2            # q tile (bf16, double-buffered)
               + 2 * t * D * out_bytes  # out tile (double-buffered)
               + 2 * 2 * Lk * D * 2     # K + V blocks (bf16, double-buffered)
               + t * D * 2              # ctx VMEM scratch (bf16)
               + 2 * t * Lk * 4         # mask-bias tile (f32, double-buffered, upper bound)
               + 4 * t * Lk * 4         # scores / exp f32 intermediates (rough)
               + D * D * 2 + 8 * D)     # Wo (bf16) + bo (f32), single copy
        if est <= budget:
            return t
    return divisors[-1]


# ----------------------------------------------------------------------------------
# Kernel 1: batched Linear (Q/K/V projections)
# ----------------------------------------------------------------------------------
def _linear_kernel(x_ref, w_ref, b_ref, o_ref):
    """o = x @ W^T + b.  x: (tm, D) bf16, w: (D, N) bf16 (pre-transposed),
    b: (1, N) f32, o: (tm, N) bf16.  f32 MXU accumulation."""
    o_ref[...] = (jnp.dot(x_ref[...], w_ref[...], preferred_element_type=jnp.float32)
                  + b_ref[...]).astype(o_ref.dtype)


def _project(x, w_t, b_row, vmem_limit):
    """Batched Linear via Pallas: (B, L, D) -> (B, L, N) in bf16."""
    B, L, D = x.shape
    N = w_t.shape[1]
    tm = _choose_row_tile(L)
    # TODO(synk): tile the contraction (D) axis for very large model sizes.
    return pl.pallas_call(
        _linear_kernel,
        out_shape=jax.ShapeDtypeStruct((B, L, N), jnp.bfloat16),
        grid=(B, L // tm),
        in_specs=[
            pl.BlockSpec((None, tm, D), lambda b, r: (b, r, 0)),   # activation tile
            _vmem_whole_spec(),                                    # W^T (single copy)
            _vmem_whole_spec(),                                    # bias (single copy)
        ],
        out_specs=pl.BlockSpec((None, tm, N), lambda b, r: (b, r, 0)),
        compiler_params=pltpu.CompilerParams(
            dimension_semantics=("parallel", "parallel"),
            vmem_limit_bytes=vmem_limit),
    )(x.astype(jnp.bfloat16), w_t, b_row)


# ----------------------------------------------------------------------------------
# Kernel 2: attention (+ fused output projection)
# ----------------------------------------------------------------------------------
def _attention_kernel(qp_ref, kp_ref, vp_ref, bias_ref, wo_ref, bo_ref, o_ref, ctx_ref,
                      *, num_heads, head_size):
    """One grid step == (one batch element, one q-row tile).

    qp_ref : (tq, D) bf16 projected & pre-scaled q
    kp_ref : (Lk, D) bf16 projected k       vp_ref : (Lk, D) bf16 projected v
    bias_ref: (1 or tq, Lk) f32 additive mask (0 keep / -1e30 masked)
    wo_ref : (D, D) bf16 Wo^T (whole-array VMEM)    bo_ref : (1, D) f32
    o_ref  : (tq, D) out dtype              ctx_ref: (tq, D) bf16 VMEM scratch
    """
    f32 = jnp.float32
    bf16 = jnp.bfloat16
    bias = bias_ref[...]

    # TODO(synk): for long sequences add an Lk grid axis ("arbitrary", innermost) with
    # an online/flash softmax so K/V stream in (tk, D) tiles instead of full Lk blocks.
    # TODO(synk): for head_size < 128 with large D, a head-major (H, L, hd) projection
    # layout would avoid the sub-128 lane slicing below.
    # TODO(synk): for large num_heads, replace the static unroll with
    # lax.fori_loop(..., unroll=True) over small head chunks.
    for h in range(num_heads):
        lo = h * head_size
        hi = lo + head_size
        qh = qp_ref[:, lo:hi]                          # (tq, hd) bf16
        kh = kp_ref[:, lo:hi]                          # (Lk, hd) bf16
        vh = vp_ref[:, lo:hi]                          # (Lk, hd) bf16

        # scores = qh @ kh^T (contract head dim, no transpose), f32 accumulation.
        scores = jax.lax.dot_general(
            qh, kh, (((1,), (1,)), ((), ())), preferred_element_type=f32)
        scores = scores + bias                         # additive mask (finite => no NaN)

        # Softmax in f32; denominator via the EUP approximate reciprocal.
        m = jnp.max(scores, axis=-1, keepdims=True)
        e = jnp.exp(scores - m)
        s = jnp.sum(e, axis=-1, keepdims=True)
        attn = (e * pl.reciprocal(s, approx=True)).astype(bf16)

        # Store this head's context at its lane offset; single Wo GEMM afterwards.
        ctx_ref[:, lo:hi] = jnp.dot(
            attn, vh, preferred_element_type=f32).astype(bf16)

    o_ref[...] = (jnp.dot(ctx_ref[...], wo_ref[...], preferred_element_type=f32)
                  + bo_ref[...]).astype(o_ref.dtype)


# ----------------------------------------------------------------------------------
# Public forward
# ----------------------------------------------------------------------------------
def attention_forward(q, k, v, mask, params, num_heads, out_dtype=None):
    """q: (B, Lq, D); k, v: (B, Lk, D); mask: bool, broadcastable to (B, 1, Lq, Lk)
    (or None).  Returns (B, Lq, D) in `out_dtype` (default: q.dtype), matching the
    PyTorch module's forward."""
    B, Lq, D = q.shape
    Lk = k.shape[1]
    assert D % num_heads == 0, "model size must be divisible by num_heads"
    head_size = D // num_heads
    out_dtype = jnp.dtype(out_dtype) if out_dtype is not None else jnp.dtype(q.dtype)

    bf16 = jnp.bfloat16
    f32 = jnp.float32
    scale = 1.0 / math.sqrt(head_size)
    vmem_limit = _vmem_limit_bytes()

    # PyTorch Linear: y = x @ W^T + b.  Pre-transpose; fold the q scale into Wq/bq.
    wq_t = (params["wq"].T * scale).astype(bf16)           # (D, D)
    wk_t = params["wk"].T.astype(bf16)
    wv_t = params["wv"].T.astype(bf16)
    wo_t = params["wo"].T.astype(bf16)
    bq = (params["bq"] * scale).reshape(1, D).astype(f32)
    bk = params["bk"].reshape(1, D).astype(f32)
    bv = params["bv"].reshape(1, D).astype(f32)
    bo = params["bo"].reshape(1, D).astype(f32)

    # Q/K/V projections run once (not once per q tile), emitting bf16 (B, L, D).
    qp = _project(q, wq_t, bq, vmem_limit)
    kp = _project(k, wk_t, bk, vmem_limit)
    vp = _project(v, wv_t, bv, vmem_limit)

    # Compact additive mask bias (B, mLq, Lk) with mLq in {1, Lq}.
    if mask is None:
        bias = jnp.zeros((B, 1, Lk), f32)
    else:
        m = jnp.asarray(mask, dtype=bool)
        if m.ndim == 4:
            if m.shape[1] != 1:
                raise NotImplementedError("per-head masks (mask.shape[1] > 1) are not supported")
            m = m[:, 0]
        elif m.ndim == 2:
            m = m[:, None, :]
        elif m.ndim == 1:
            m = m[None, None, :]
        m = jnp.broadcast_to(m, (B, m.shape[-2], Lk))
        # NOTE: finite -1e30 => fully-masked rows yield a uniform average over keys
        # instead of the reference's NaN (softmax over all -inf).
        bias = jnp.where(m, 0.0, -1e30).astype(f32)
    mLq = bias.shape[1]
    assert mLq in (1, Lq), "mask q-extent must be 1 or Lq"

    tq = _choose_q_tile(Lq, D, Lk, out_dtype.itemsize, vmem_limit)
    n_q = Lq // tq

    if mLq == 1:
        bias_spec = pl.BlockSpec((None, 1, Lk), lambda b, qi: (b, 0, 0))
    else:
        bias_spec = pl.BlockSpec((None, tq, Lk), lambda b, qi: (b, qi, 0))

    kernel = functools.partial(_attention_kernel,
                               num_heads=num_heads, head_size=head_size)

    # Grid (batch, q-tile), qi innermost: K/V block indices are constant across
    # consecutive qi steps, so Pallas does not re-DMA them.  No cross-step scratch
    # dependence, so both axes stay "parallel" (feeds both v7x TensorCores).
    return pl.pallas_call(
        kernel,
        out_shape=jax.ShapeDtypeStruct((B, Lq, D), out_dtype),
        grid=(B, n_q),
        in_specs=[
            pl.BlockSpec((None, tq, D), lambda b, qi: (b, qi, 0)),   # q projection tile
            pl.BlockSpec((None, Lk, D), lambda b, qi: (b, 0, 0)),    # k projection
            pl.BlockSpec((None, Lk, D), lambda b, qi: (b, 0, 0)),    # v projection
            bias_spec,                                               # additive mask bias
            _vmem_whole_spec(),                                      # Wo^T (single copy)
            _vmem_whole_spec(),                                      # bo  (single copy)
        ],
        out_specs=pl.BlockSpec((None, tq, D), lambda b, qi: (b, qi, 0)),
        scratch_shapes=[pltpu.VMEM((tq, D), bf16)],                  # head-packed context
        compiler_params=pltpu.CompilerParams(
            dimension_semantics=("parallel", "parallel"),
            vmem_limit_bytes=vmem_limit),
    )(qp, kp, vp, bias, wo_t, bo)


# ----------------------------------------------------------------------------------
# Pure-JAX reference (mirrors the PyTorch forward) and demo
# ----------------------------------------------------------------------------------
def attention_reference(q, k, v, mask, params, num_heads):
    B, Lq, D = q.shape
    Lk = k.shape[1]
    hd = D // num_heads

    def lin(x, w, b):
        return x @ w.T + b

    kp = lin(k, params["wk"], params["bk"]).reshape(B, Lk, num_heads, hd).transpose(0, 2, 1, 3)
    vp = lin(v, params["wv"], params["bv"]).reshape(B, Lk, num_heads, hd).transpose(0, 2, 1, 3)
    qp = lin(q, params["wq"], params["bq"]).reshape(B, Lq, num_heads, hd).transpose(0, 2, 1, 3)
    qp = qp / math.sqrt(hd)

    scores = jnp.einsum('bhqd,bhkd->bhqk', qp, kp)
    scores = jnp.where(jnp.broadcast_to(mask, scores.shape), scores, -jnp.inf)
    attn = jax.nn.softmax(scores, axis=-1)
    ctx = jnp.einsum('bhqk,bhkd->bhqd', attn, vp)
    ctx = ctx.transpose(0, 2, 1, 3).reshape(B, Lq, D)
    return lin(ctx, params["wo"], params["bo"])


def make_params(key, size):
    ks = jax.random.split(key, 8)
    bound = 1.0 / math.sqrt(size)
    u = lambda kk, shape: jax.random.uniform(kk, shape, jnp.float32, -bound, bound)
    return {
        "wq": u(ks[0], (size, size)), "bq": u(ks[1], (size,)),
        "wk": u(ks[2], (size, size)), "bk": u(ks[3], (size,)),
        "wv": u(ks[4], (size, size)), "bv": u(ks[5], (size,)),
        "wo": u(ks[6], (size, size)), "bo": u(ks[7], (size,)),
    }


if __name__ == "__main__":
    num_heads = 4
    size = 32            # model size D; head_size = 8
    B, Lq, Lk = 2, 8, 8

    root = jax.random.PRNGKey(0)
    kq, kk, kv, kp = jax.random.split(root, 4)

    q = jax.random.normal(kq, (B, Lq, size), jnp.float32)
    k = jax.random.normal(kk, (B, Lk, size), jnp.float32)
    v = jax.random.normal(kv, (B, Lk, size), jnp.float32)
    params = make_params(kp, size)

    # Padding-style mask (B, 1, 1, Lk): batch 1 has its last 2 key positions masked.
    mask = jnp.ones((B, 1, 1, Lk), dtype=bool)
    mask = mask.at[1, :, :, -2:].set(False)

    out = attention_forward(q, k, v, mask, params, num_heads)
    out = jax.block_until_ready(out)

    ref = attention_reference(q, k, v, mask, params, num_heads)
    err = float(jnp.max(jnp.abs(out - ref)))
    assert out.shape == (B, Lq, size)
    # bf16 matmul path -> looser tolerance than a pure-f32 kernel.
    assert jnp.allclose(out, ref, atol=3e-2, rtol=3e-2), f"max abs err = {err}"

    print("KERNEL_OK")
</pallas_src>

<mosaic_0001>
module attributes {stable_mosaic.version = 11 : i64} {
  func.func @_linear_kernel(%arg0: i32, %arg1: i32, %arg2: memref<1x8x32xbf16, #tpu.memory_space<vmem>>, %arg3: memref<32x32xbf16, #tpu.memory_space<vmem>>, %arg4: memref<1x32xf32, #tpu.memory_space<vmem>>, %arg5: memref<1x8x32xbf16, #tpu.memory_space<vmem>>) attributes {dimension_semantics = [#tpu.dimension_semantics<parallel>, #tpu.dimension_semantics<parallel>], iteration_bounds = array<i64: 2, 1>, scalar_prefetch = 0 : i64, scratch_operands = 0 : i64, tpu.core_type = #tpu.core_type<tc>, window_params = [{transform_indices = @transform_0, window_bounds = array<i64: 1, 8, 32>}, {pipeline_mode = #tpu.pipeline_mode<synchronous>, transform_indices = @transform_1, window_bounds = array<i64: 32, 32>}, {pipeline_mode = #tpu.pipeline_mode<synchronous>, transform_indices = @transform_2, window_bounds = array<i64: 1, 32>}, {transform_indices = @transform_3, window_bounds = array<i64: 1, 8, 32>}]} {
    %c0 = arith.constant 0 : index
    %c0_0 = arith.constant 0 : index
    %c0_1 = arith.constant 0 : index
    %0 = vector.load %arg2[%c0, %c0_0, %c0_1] : memref<1x8x32xbf16, #tpu.memory_space<vmem>>, vector<1x8x32xbf16>
    %1 = vector.shape_cast %0 : vector<1x8x32xbf16> to vector<8x32xbf16>
    %c0_2 = arith.constant 0 : index
    %c0_3 = arith.constant 0 : index
    %2 = vector.load %arg3[%c0_2, %c0_3] : memref<32x32xbf16, #tpu.memory_space<vmem>>, vector<32x32xbf16>
    %cst = arith.constant dense<0.000000e+00> : vector<8x32xf32>
    %3 = tpu.matmul %1, %2, %cst {dimension_numbers = #tpu.dot_dimension_numbers<[1], [0], [0], [1], [0, 0, 1, 1], [], []>} : vector<8x32xbf16>, vector<32x32xbf16>, vector<8x32xf32> -> vector<8x32xf32>
    %c0_4 = arith.constant 0 : index
    %c0_5 = arith.constant 0 : index
    %4 = vector.load %arg4[%c0_4, %c0_5] : memref<1x32xf32, #tpu.memory_space<vmem>>, vector<1x32xf32>
    %5 = vector.broadcast %4 : vector<1x32xf32> to vector<8x32xf32>
    %6 = arith.addf %3, %5 : vector<8x32xf32>
    %7 = arith.truncf %6 : vector<8x32xf32> to vector<8x32xbf16>
    %c0_6 = arith.constant 0 : index
    %c0_7 = arith.constant 0 : index
    %c0_8 = arith.constant 0 : index
    %8 = vector.load %arg5[%c0_6, %c0_7, %c0_8] : memref<1x8x32xbf16, #tpu.memory_space<vmem>>, vector<1x8x32xbf16>
    %9 = vector.shape_cast %8 : vector<1x8x32xbf16> to vector<8x32xbf16>
    %10 = vector.shape_cast %7 : vector<8x32xbf16> to vector<1x8x32xbf16>
    tpu.vector_store %arg5[%c0_6, %c0_7, %c0_8], %10 {strides = array<i32>} : memref<1x8x32xbf16, #tpu.memory_space<vmem>>, vector<1x8x32xbf16>,
    return
  }
  func.func @transform_0(%arg0: i32, %arg1: i32) -> (i32, i32, i32) {
    %c0_i32 = arith.constant 0 : i32
    %c0_i32_0 = arith.constant 0 : i32
    return %arg0, %arg1, %c0_i32 : i32, i32, i32
  }
  func.func @transform_1(%arg0: i32, %arg1: i32) -> (i32, i32) {
    %c0_i32 = arith.constant 0 : i32
    %c0_i32_0 = arith.constant 0 : i32
    %c0_i32_1 = arith.constant 0 : i32
    return %c0_i32, %c0_i32_0 : i32, i32
  }
  func.func @transform_2(%arg0: i32, %arg1: i32) -> (i32, i32) {
    %c0_i32 = arith.constant 0 : i32
    %c0_i32_0 = arith.constant 0 : i32
    %c0_i32_1 = arith.constant 0 : i32
    return %c0_i32, %c0_i32_0 : i32, i32
  }
  func.func @transform_3(%arg0: i32, %arg1: i32) -> (i32, i32, i32) {
    %c0_i32 = arith.constant 0 : i32
    %c0_i32_0 = arith.constant 0 : i32
    return %arg0, %arg1, %c0_i32 : i32, i32, i32
  }
}

</mosaic_0001>

<bundles_post_ra>
// kernel: tpu_custom_call.1
= control target key start
LH: loop header
LB: loop body
LE: loop exit
PB: predicated region body
PF: predicated region fallthrough
CT: control target
= control target key end

     0   :  { %8 = vsyncpa [#allocation3], 0  ;;  %s853_s0 = inlined_call_operand.hbm [shape: bf16[2,8,32], index: 0, kind: input, shape index: {}]   ;;  %s854_s1 = inlined_call_operand.hbm [shape: bf16[32,32], index: 1, kind: input, shape index: {}]   ;;  %s855_s2 = inlined_call_operand.vmem [shape: f32[1,32], index: 2, kind: input, shape index: {}]   ;;  %s856_s3 = inlined_call_operand.hbm [shape: bf16[2,8,32], index: 3, kind: output, shape index: {}]  }
   0x1   :  { %10 = vsyncpa [#allocation3 + $0x1], 0 }
   0x2   :  { %11 = vsyncpa [#allocation6], 0 }
   0x3   :  { %12 = vsyncpa [#allocation4], 0 }
   0x4   :  { %14 = vsyncpa [#allocation4 + $0x1], 0  ;;  %s671_s12 = smov 0   ;;  %s673_s13 = smov 0  }
   0x5   :  { %s675_s14 = smov 0   ;;  %s677_s15 = smov 0  }
   0x6   :  { %s679_s16 = smov 0   ;;  %s681_s17 = smov 0  }
   0x7 LB: > { %s395_s18 = sadd.s32 4294967295, %s642_s17   ;;  %s396_s19 = sadd.s32 4294967294, %s642_s17   ;;  %s642_s17 = sphi %s681_s17, %s20_s17   ;;  %s638_s16 = sphi %s679_s16, %s874_s16   ;;  %s634_s15 = sphi %s677_s15, %s873_s15   ;;  %s630_s14 = sphi %s675_s14, %s872_s14   ;;  %s626_s13 = sphi %s673_s13, %s871_s13   ;;  %s622_s12 = sphi %s671_s12, %s870_s12  }
   0x8   : > { %p54_p0 = scmp.ne.s32.totalorder %s626_s13, %s622_s12  ;;  %p705_p1 = scmp.eq.s32.totalorder %s395_s18, 0 }
   0x9   : > { %p709_p2 = scmp.eq.s32.totalorder %s395_s18, 1  ;;  %p128_p3 = scmp.eq.s32.totalorder %s396_s19, 1 }
   0xa   : > { %p715_p4 = por %p705_p1, %p54_p0  ;;  %p397_p5 = scmp.ge.s32.totalorder %s642_s17, 1 }
   0xb   : > { %p720_p6 = por %p128_p3, %p54_p0  ;;  %p135_p7 = scmp.lt.s32.totalorder %s642_s17, 3 }
   0xc   : > { %s860_s22 = scalar_select %p715_p4, 1, 0 }
   0xd   : > { %s861_s23 = scalar_select %p720_p6, 1, 0 }
   0xe   : > { %p725_p8 = pnand %p397_p5, %p135_p7  ;;  %s644_s25 = smov [#allocation5]  }
   0xf   : > { %s147_s26 = sshll.u32 %s644_s25, 4  ;;  %s32_s28 = sadd.s32 1, %s638_s16  ;;  %s148_s26 = int_to_ptr.vmem [resolvable:$true] %s147_s26 }
  0x10   : > { %p433_p9 = pneg %p725_p8  ;;  %s515_s29 = scalar_lea.vmem %s148_s26, 256 }
  0x11   : > { %p516_p13 = scmp.ne.s32.totalorder %s148_s26, %s515_s29  ;;  %p523_p5 = scmp.lt.s32.totalorder %s148_s26, %s148_s26 }
  0x12   : > { %p734_p11 = pnand %p433_p9, %p705_p1  ;;  %p524_p7 = scmp.lt.s32.totalorder %s515_s29, %s515_s29 }
  0x14   : > { %p506_p12 = pneg %p734_p11  ;;  %p525_p6 = por %p524_p7, %p523_p5 }
  0x16   : > { %p518_p0 = pnand %p516_p13, %p506_p12 }
  0x18   : > { %p519_p3 = pneg %p518_p0 }
  0x1a   : > { %p526_p4 = pnand %p525_p6, %p519_p3 }
  0x1c   : > { %529 = shalt.err (!%p526_p4)
}
  0x1d   : > { %s645_s30 = smov 64   ;;  %s646_s4 = smov 4  }
  0x1e   : > { %436 = dma.hbm_to_vmem [thread:$0]  (!%p734_p11), %s854_s1, 256, %s148_s26, [#allocation6], %s645_s30, %s645_s30, %s646_s4  }
  0x1f   : > { %p34_p6 = scmp.ge.s32.totalorder %s32_s28, 2  ;;  %s41_s7 = sadd.s32 1, %s630_s14 }
  0x20   : > { %p48_p4 = scmp.ne.s32.totalorder %s630_s14, %s626_s13  ;;  %p49_p9 = scmp.eq.s32.totalorder %s642_s17, 0 }
  0x21   : > { %s876_s28 = smov (%p34_p6, %s32_s28), 0  ;;  %p446_p0 = scmp.lt.s32.totalorder %s642_s17, 2 }
  0x22   : > { %p752_p12 = por %p49_p9, %p48_p4  ;;  %p758_p13 = por %p709_p2, %p48_p4 }
  0x23   : > { %s36_s10 = ssub.s32 %s638_s16, %s876_s28  ;;  %s164_s11 = sand.u32 1, %s630_s14  }
  0x24   : > { %p39_p11 = scmp.eq.s32.totalorder %s36_s10, 0  ;;  %s400_s18 = sshll.u32 %s164_s11, 2 }
  0x25   : > { %s401_s25 = sshll.u32 %s638_s16, 6  ;;  %s168_s30 = scalar_lea.vmem [#allocation2], %s400_s18 }
  0x26   : > { %s767_s19 = scalar_select %p39_p11, %s630_s14, %s41_s7  }
  0x27   : > { %s174_s29 = scalar_lea.hbm %s853_s0, %s401_s25  ;;  %s176_s4 = sshll.u32 %s168_s30, 4  ;;  %s177_s4 = int_to_ptr.vmem [resolvable:$true] %s176_s4 }
  0x28   : > { %p775_p2 = pnand %p446_p0, %p752_p12  ;;  %s165_s5 = scalar_lea.sflag [#allocation3], %s164_s11 }
  0x29   : > { %s543_s6 = scalar_lea.vmem %s177_s4, 64  ;;  %s647_s7 = smov [#allocation2]  }
  0x2a   : > { %p532_p3 = pneg %p775_p2  ;;  %p544_p5 = scmp.ne.s32.totalorder %s177_s4, %s543_s6 }
  0x2b   : > { %s548_s10 = sshll.u32 %s647_s7, 4  ;;  %s549_s10 = int_to_ptr.vmem [resolvable:$false] %s548_s10 }
  0x2c   : > { %p546_p7 = pnand %p544_p5, %p532_p3  ;;  %s550_s25 = scalar_lea.vmem %s549_s10, 128 }
  0x2d   : > { %p551_p4 = scmp.lt.s32.totalorder %s177_s4, %s549_s10  ;;  %p552_p9 = scmp.lt.s32.totalorder %s550_s25, %s543_s6 }
  0x2e   : > { %p547_p6 = pneg %p546_p7 }
  0x2f   : > { %p553_p11 = por %p552_p9, %p551_p4 }
  0x31   : > { %p554_p10 = pnand %p553_p11, %p547_p6 }
  0x33   : > { %557 = shalt.err (!%p554_p10)
}
  0x34   : > { %440 = dma.hbm_to_vmem [thread:$0]  (!%p775_p2), %s174_s29, 64, %s177_s4, %s165_s5  }
  0x35   : > { %185 = sbr.rel (%p725_p8) target bundleno = 281 (0x119), region = 32  ;;  %s786_s8 = sand.u32 (!%p725_p8), 1, %s626_s13  }
  0x36   : > { %s403_s11 = sshll.u32 (!%p725_p8), %s786_s8, 2  ;;  %s188_s18 = scalar_lea.sflag (!%p725_p8), [#allocation3], %s786_s8 }
  0x37   : > { %s191_s26 = scalar_lea.vmem (!%p725_p8), [#allocation2], %s403_s11  ;;  %p867_p12 = scmp.ne.s32.totalorder (!%p725_p8), %s860_s22, 0 }
  0x3a   : > { %609 = dma.done.wait (%p867_p12), %s188_s18, 64  }
  0x3b   : > { %611 = vsyncadd (%p867_p12), %s188_s18, 4294967232 }
  0x3c   : > { %613 = dma.done.wait (%p705_p1), [#allocation6], 256  }
  0x3d   : > { %615 = vsyncadd (%p705_p1), [#allocation6], 4294967040  ;;  %v648_v0 = vmov 0.0   ;;  %vm649_vm0 = vmmov 0   ;;  %v502_v1 = vld [vmem:[#allocation5 + $0x8] sm:$0xff]   ;;  %v503_v2 = vld [vmem:[#allocation5] sm:$0xff]  }
  0x3e   : > { %417 = vmatprep.subr.bf16.mxu0 %v648_v0  ;;  %421 = vmatprep.mubr.msk.bf16.mxu0 %vm649_vm0, %v648_v0  ;;  %v219_v3 = vld [vmem:[%s191_s26] sm:$0xf]  ;;  %vm243_vm1 = vcmask 261120   ;;  %s411_s20 = sshll.u32 %s634_s15, 6  ;;  %s217_s27 = scalar_lea.vmem [#allocation7], %s403_s11  ;;  %vm288_vm2 = vcmask 257024  }
  0x3f   : > { %418 = vmatpush3.bf16.msra.mxu0 %v502_v1  ;;  %v406_v4 = vld [vmem:[%s855_s2] ss:$0 sm:$0xff]  ;;  %s305_s29 = sshll.u32 %s217_s27, 4  ;;  %s805_s21 = scalar_lea.hbm %s856_s3, %s411_s20  ;;  %s807_s29 = int_to_ptr.vmem [resolvable:$true] %s305_s29 }
  0x40   : > { %419 = vmatprep.subr.bf16.mxu0 %v648_v0  ;;  %s291_s15 = scalar_lea.sflag [#allocation4], %s786_s8  ;;  %s558_s5 = scalar_lea.vmem %s807_s29, 64 }
  0x41   : > { %p559_p1 = scmp.ne.s32.totalorder %s807_s29, %s558_s5  ;;  %s650_s6 = smov [#allocation7]  }
  0x42   : > { %s562_s7 = sshll.u32 %s650_s6, 4  ;;  %s563_s7 = int_to_ptr.vmem [resolvable:$false] %s562_s7 }
  0x43   : > { %420 = vmatpush3.bf16.msra.mxu0 %v503_v2  ;;  %p560_p8 = pnand %p559_p1, %p758_p13  ;;  %s564_s10 = scalar_lea.vmem %s563_s7, 128 }
  0x44   : > { %p565_p0 = scmp.lt.s32.totalorder %s807_s29, %s563_s7  ;;  %p566_p2 = scmp.lt.s32.totalorder %s564_s10, %s558_s5 }
  0x45   : > { %p561_p10 = pneg %p560_p8 }
  0x46   : > { %422 = vmatmul.mubr.msk.bf16.vlgmr.msra.gmra.mxu0 %vm243_vm1, %v219_v3  ;;  %p567_p3 = por %p566_p2, %p565_p0 }
  0x48   : > { %p568_p5 = pnand %p567_p3, %p561_p10 }
 0x106   : > { %v281_v5 = vpop.f32.mrf.mxu0 }
 0x107   : > { %v282_v6 = vadd.f32 %v406_v4, %v281_v5 }
 0x108   : > { %v423_v7 = vpop.f32.mrf.mxu0 }
 0x109   : > { %v287_v8 = vpack.c.bf16 %v282_v6, %v282_v6 }
 0x10a   : > { %v284_v9 = vpop.f32.mrf.mxu0 }
 0x10b   : > { %289 = vst.msk [vmem:[%s217_s27] sm:$0xf] %vm288_vm2, %v287_v8 }
 0x10c   : > { %v424_v10 = vpop.f32.mrf.mxu0 }
 0x10d   : > { %571 = shalt.err (!%p568_p5)
}
 0x10e   : > { %s572_s25 = scalar_lea.hbm %s805_s21, 64  ;;  %s576_s18 = scalar_lea.hbm %s856_s3, 128 }
 0x10f   : > { %p573_p7 = scmp.ne.s32.totalorder %s805_s21, %s572_s25  ;;  %p577_p9 = scmp.lt.s32.totalorder %s805_s21, %s856_s3 }
 0x110   : > { %p578_p11 = scmp.lt.s32.totalorder %s576_s18, %s572_s25 }
 0x111   : > { %p574_p6 = pnand %p573_p7, %p758_p13 }
 0x112   : > { %p579_p12 = por %p578_p11, %p577_p9 }
 0x113   : > { %p575_p4 = pneg %p574_p6 }
 0x115   : > { %p580_p1 = pnand %p579_p12, %p575_p4 }
 0x117   : > { %583 = shalt.err (!%p580_p1)
}
 0x118   : > { %431 = dma.vmem_to_hbm [thread:$0]  (%p758_p13), %s807_s29, 64, %s805_s21, %s291_s15  }
 0x119 PF: > { %s317_s24 = sand.u32 1, %s622_s12   ;;  %p868_p8 = scmp.ne.s32.totalorder %s861_s23, 0 }
 0x11a   : > { %p869_p10 = scmp.ge.s32.totalorder %s642_s17, 2  ;;  %s318_s20 = scalar_lea.sflag [#allocation4], %s317_s24 }
 0x11c   : > { %p442_p0 = pnand %p869_p10, %p868_p8 }
 0x11e   : > { %p443_p2 = pneg %p442_p0 }
 0x120   : > { %617 = dma.done.wait (%p443_p2), %s318_s20, 64  }
 0x121   : > { %619 = vsyncadd (%p443_p2), %s318_s20, 4294967232  ;;  %s20_s17 = sadd.s32 1, %s642_s17   ;;  %s870_s12 = smov %s626_s13 }
 0x122   : > { %p17_p3 = scmp.ge.s32.totalorder %s20_s17, 4   ;;  %s871_s13 = smov %s630_s14 }
 0x123   : > { %s872_s14 = smov %s767_s19  ;;  %s873_s15 = smov %s638_s16 }
 0x124   : > { %s874_s16 = smov %s876_s28  ;;  %19 = sbr.rel (!%p17_p3) target bundleno = 7 (0x7), region = 81 }
 0x129   :  { %323 = vsyncpa [#allocation3], 1 }
 0x12a   :  { %325 = vsyncpa [#allocation3 + $0x1], 1 }
 0x12b   :  { %326 = vsyncpa [#allocation6], 1 }
 0x12c   :  { %327 = vsyncpa [#allocation4], 1 }
 0x12d   :  { %329 = vsyncpa [#allocation4 + $0x1], 1 }

</bundles_post_ra>
